<compile_context>
chip_gen: v7x
topology: tpu7x:2x2x1
jax: 0.10.0
libtpu: 0.0.40
codegen_flags: <defaults>
</compile_context>

<pallas_src>
import functools

import numpy as np
import jax
import jax.numpy as jnp
from jax.experimental import pallas as pl
from jax.experimental.pallas import tpu as pltpu


def _welford_update(data, valid, j, t_hw, n_t, m_ref, m2_ref):
    """Merge one (R, t_hw) f32 tile into running per-row (mean, M2) refs."""
    n_prev = (j * t_hw).astype(jnp.float32)
    n_t_f = jnp.float32(n_t)
    n_new = n_prev + n_t_f
    if valid is not None:
        data = jnp.where(valid, data, 0.0)
    m_t = jnp.sum(data, axis=-1, keepdims=True) * (1.0 / n_t)       # (R, 1)
    d = data - m_t
    if valid is not None:
        d = jnp.where(valid, d, 0.0)
    m2_t = jnp.sum(d * d, axis=-1, keepdims=True)                    # (R, 1)
    mean_old = m_ref[...]
    delta = m_t - mean_old
    frac = n_t_f / n_new
    m_ref[...] = mean_old + delta * frac
    m2_ref[...] = m2_ref[...] + m2_t + delta * delta * (n_prev * frac)


def _gaa_stats_kernel(src_ref, tgt_ref, mx_ref, m2x_ref, my_ref, m2y_ref,
                      *, t_hw, n_t_tail, needs_mask):
    # src_ref / tgt_ref : (R, t_hw) blocks in VMEM (native dtype)
    # m*_ref            : (R, 1) f32 output blocks, resident across the j axis
    g = pl.program_id(1)
    j = pl.program_id(2)

    @pl.when(j == 0)
    def _init():
        mx_ref[...] = jnp.zeros_like(mx_ref)
        m2x_ref[...] = jnp.zeros_like(m2x_ref)
        my_ref[...] = jnp.zeros_like(my_ref)
        m2y_ref[...] = jnp.zeros_like(m2y_ref)

    x = src_ref[...].astype(jnp.float32)
    y = tgt_ref[...].astype(jnp.float32)

    def accumulate(n_t, valid):
        _welford_update(x, valid, j, t_hw, n_t, mx_ref, m2x_ref)
        _welford_update(y, valid, j, t_hw, n_t, my_ref, m2y_ref)

    if needs_mask:
        # Only the globally-last tile is partial; only it pays for the mask.
        is_tail = jnp.logical_and(g == pl.num_programs(1) - 1,
                                  j == pl.num_programs(2) - 1)

        @pl.when(jnp.logical_not(is_tail))
        def _full():
            accumulate(t_hw, None)

        @pl.when(is_tail)
        def _tail():
            lane = jax.lax.broadcasted_iota(jnp.int32, x.shape, 1)
            accumulate(n_t_tail, lane < n_t_tail)
    else:
        accumulate(t_hw, None)


def _round_up(x, m):
    return (x + m - 1) // m * m


def gaa_pallas(source_nchw, target_nchw, *, max_block_bytes=4 * 1024 * 1024):
    """source/target: (B, C, H, W) like the PyTorch module. Returns (B,) f32."""
    assert source_nchw.shape == target_nchw.shape
    B, C, H, W = source_nchw.shape
    HW = H * W
    dtype = source_nchw.dtype
    itemsize = jnp.dtype(dtype).itemsize
    sublane_mult = max(8, 32 // itemsize)    # rows/vreg: f32=8, bf16=16, i8=32

    # --- sublane packing: (B, C, HW) -> (B, C*k, HW//k), free reshape --------
    k = 1
    if C < sublane_mult:
        desired = -(-sublane_mult // C)                    # ceil
        for cand in range(min(desired, HW), 0, -1):
            if HW % cand == 0:
                k = cand
                break
    R = C * k
    L = HW // k
    x = source_nchw.reshape(B, R, L)
    y = target_nchw.reshape(B, R, L)

    # --- spatial tile width from a sublane-padding-aware byte budget ---------
    pad_r = _round_up(R, sublane_mult)
    cap = max(128, (max_block_bytes // (pad_r * itemsize)) // 128 * 128)
    t_hw = L if L <= cap else cap            # full-dim block allowed for small L
    n_hw = -(-L // t_hw)
    needs_mask = (n_hw * t_hw != L)
    n_t_tail = L - (n_hw - 1) * t_hw

    # --- split the spatial reduction across 2 parallel groups when B == 1 ----
    G = 2 if (B == 1 and n_hw >= 2 and n_hw % 2 == 0) else 1
    n_inner = n_hw // G

    kernel = functools.partial(_gaa_stats_kernel, t_hw=t_hw,
                               n_t_tail=n_t_tail, needs_mask=needs_mask)

    in_spec = pl.BlockSpec((None, R, t_hw),
                           lambda b, g, j: (b, 0, g * n_inner + j))
    out_spec = pl.BlockSpec((None, None, R, 1), lambda b, g, j: (b, g, 0, 0))
    stat_shape = jax.ShapeDtypeStruct((B, G, R, 1), jnp.float32)

    cost = pl.CostEstimate(
        flops=int(12 * B * R * L),
        transcendentals=0,
        bytes_accessed=int(2 * B * R * L * itemsize + 16 * B * G * R))

    mean_x, m2_x, mean_y, m2_y = pl.pallas_call(
        kernel,
        out_shape=(stat_shape, stat_shape, stat_shape, stat_shape),
        grid=(B, G, n_inner),
        in_specs=[in_spec, in_spec],
        out_specs=(out_spec, out_spec, out_spec, out_spec),
        compiler_params=pltpu.CompilerParams(
            dimension_semantics=("parallel", "parallel", "arbitrary"),
            vmem_limit_bytes=48 * 1024 * 1024),
        cost_estimate=cost,
    )(x, y)

    # --- tiny O(B*G*C*k) epilogue: merge sub-streams, apply GAA formula ------
    cnt = np.full((G,), n_inner * t_hw, dtype=np.float32)
    cnt[-1] = L - (G - 1) * n_inner * t_hw          # last group owns the tail
    cnt = jnp.asarray(cnt).reshape(1, G, 1, 1)
    hw_f = jnp.float32(HW)

    def combine(mean, m2):
        mean = mean.reshape(B, G, C, k)
        m2 = m2.reshape(B, G, C, k)
        u = jnp.sum(cnt * mean, axis=(1, 3)) / hw_f                   # (B, C)
        dev = mean - u[:, None, :, None]
        m2_tot = jnp.sum(m2, axis=(1, 3)) + jnp.sum(cnt * dev * dev, axis=(1, 3))
        return u, jnp.sqrt(m2_tot / hw_f)                             # mean, std

    ux, vx = combine(mean_x, m2_x)
    uy, vy = combine(mean_y, m2_y)
    diffu = jnp.sum((ux - uy) ** 2, axis=1)
    diffv = jnp.sum((vx - vy) ** 2, axis=1)
    return (diffu + diffv) * (hw_f / jnp.float32(C * C))


class GAALoss:
    """JAX port of GAA_Loss. `gaa_flag` mirrors self.GAA in the PyTorch module."""

    def __init__(self, gaa_flag: int):
        self.gaa_flag = gaa_flag
        self.loss = 0

    def __call__(self, source_feature, target_feature):
        if self.gaa_flag == 1:
            self.loss = gaa_pallas(source_feature, target_feature)
        return self.loss


def _gaa_reference(source, target):
    # Pure-JAX reference mirroring the PyTorch math exactly (two-pass std).
    B, C, H, W = source.shape
    HW = H * W
    x = jnp.transpose(source.reshape(B, C, HW), (0, 2, 1)).astype(jnp.float32)
    y = jnp.transpose(target.reshape(B, C, HW), (0, 2, 1)).astype(jnp.float32)
    n = 2.0 * HW
    ux = jnp.sum(x, axis=1) * 2.0 / n
    uy = jnp.sum(y, axis=1) * 2.0 / n
    diffu = jnp.sum((ux - uy) ** 2, axis=1)
    vx = jnp.sqrt(jnp.sum((x - ux[:, None, :]) ** 2, axis=1) * 2.0 / n)
    vy = jnp.sqrt(jnp.sum((y - uy[:, None, :]) ** 2, axis=1) * 2.0 / n)
    diffv = jnp.sum((vx - vy) ** 2, axis=1)
    return (diffu + diffv) / (C * C) * HW


if __name__ == "__main__":
    key = jax.random.PRNGKey(0)
    k1, k2, k3, k4, k5, k6 = jax.random.split(key, 6)

    # Primary small shape (exercises sublane packing: C=4 f32 -> k=2, R=8).
    # Non-zero means stress the robust (Welford) moment accumulation.
    B, C, H, W = 2, 4, 16, 16
    source = jax.random.normal(k1, (B, C, H, W), dtype=jnp.float32) + 1.5
    target = jax.random.normal(k2, (B, C, H, W), dtype=jnp.float32) + 0.5
    loss_mod = GAALoss(gaa_flag=1)
    out = jax.block_until_ready(loss_mod(source, target))
    ref = jax.block_until_ready(_gaa_reference(source, target))
    assert out.shape == (B,)
    assert jnp.allclose(out, ref, rtol=1e-4, atol=1e-5), (out, ref)

    # Tiled spatial loop with a masked tail (HW=130 -> forced 128-wide tiles).
    B2, C2, H2, W2 = 2, 8, 10, 13
    s2 = jax.random.normal(k3, (B2, C2, H2, W2), dtype=jnp.float32) + 2.0
    t2 = jax.random.normal(k4, (B2, C2, H2, W2), dtype=jnp.float32)
    out2 = jax.block_until_ready(gaa_pallas(s2, t2, max_block_bytes=4096))
    ref2 = jax.block_until_ready(_gaa_reference(s2, t2))
    assert out2.shape == (B2,)
    assert jnp.allclose(out2, ref2, rtol=1e-4, atol=1e-5), (out2, ref2)

    # B=1: spatial reduction split across G=2 parallel groups (both TCs on v7x),
    # partial stats merged in the wrapper.
    B3, C3, H3, W3 = 1, 4, 16, 32
    s3 = jax.random.normal(k5, (B3, C3, H3, W3), dtype=jnp.float32) - 1.0
    t3 = jax.random.normal(k6, (B3, C3, H3, W3), dtype=jnp.float32)
    out3 = jax.block_until_ready(gaa_pallas(s3, t3, max_block_bytes=4096))
    ref3 = jax.block_until_ready(_gaa_reference(s3, t3))
    assert out3.shape == (B3,)
    assert jnp.allclose(out3, ref3, rtol=1e-4, atol=1e-5), (out3, ref3)

    print("KERNEL_OK")
</pallas_src>

<mosaic_0001>
module attributes {stable_mosaic.version = 11 : i64} {
  func.func @_gaa_stats_kernel(%arg0: i32, %arg1: i32, %arg2: i32, %arg3: memref<1x8x128xf32, #tpu.memory_space<vmem>>, %arg4: memref<1x8x128xf32, #tpu.memory_space<vmem>>, %arg5: memref<1x1x8x1xf32, #tpu.memory_space<vmem>>, %arg6: memref<1x1x8x1xf32, #tpu.memory_space<vmem>>, %arg7: memref<1x1x8x1xf32, #tpu.memory_space<vmem>>, %arg8: memref<1x1x8x1xf32, #tpu.memory_space<vmem>>) attributes {dimension_semantics = [#tpu.dimension_semantics<parallel>, #tpu.dimension_semantics<parallel>, #tpu.dimension_semantics<arbitrary>], iteration_bounds = array<i64: 2, 1, 1>, scalar_prefetch = 0 : i64, scratch_operands = 0 : i64, tpu.core_type = #tpu.core_type<tc>, window_params = [{transform_indices = @transform_0, window_bounds = array<i64: 1, 8, 128>}, {transform_indices = @transform_1, window_bounds = array<i64: 1, 8, 128>}, {transform_indices = @transform_2, window_bounds = array<i64: 1, 1, 8, 1>}, {transform_indices = @transform_3, window_bounds = array<i64: 1, 1, 8, 1>}, {transform_indices = @transform_4, window_bounds = array<i64: 1, 1, 8, 1>}, {transform_indices = @transform_5, window_bounds = array<i64: 1, 1, 8, 1>}]} {
    %c0_i32 = arith.constant 0 : i32
    %0 = arith.cmpi eq, %arg2, %c0_i32 : i32
    %1 = arith.extui %0 : i1 to i32
    %c0_i32_0 = arith.constant 0 : i32
    %2 = arith.cmpi ne, %1, %c0_i32_0 : i32
    scf.if %2 {
      %cst_48 = arith.constant 0.000000e+00 : f32
      %73 = vector.broadcast %cst_48 : f32 to vector<8x1xf32>
      %c0_49 = arith.constant 0 : index
      %c0_50 = arith.constant 0 : index
      %c0_51 = arith.constant 0 : index
      %c0_52 = arith.constant 0 : index
      %74 = vector.load %arg5[%c0_49, %c0_50, %c0_51, %c0_52] : memref<1x1x8x1xf32, #tpu.memory_space<vmem>>, vector<1x1x8x1xf32>
      %75 = vector.shape_cast %74 : vector<1x1x8x1xf32> to vector<8x1xf32>
      %76 = vector.shape_cast %73 : vector<8x1xf32> to vector<1x1x8x1xf32>
      tpu.vector_store %arg5[%c0_49, %c0_50, %c0_51, %c0_52], %76 {strides = array<i32>} : memref<1x1x8x1xf32, #tpu.memory_space<vmem>>, vector<1x1x8x1xf32>,
      %cst_53 = arith.constant 0.000000e+00 : f32
      %77 = vector.broadcast %cst_53 : f32 to vector<8x1xf32>
      %c0_54 = arith.constant 0 : index
      %c0_55 = arith.constant 0 : index
      %c0_56 = arith.constant 0 : index
      %c0_57 = arith.constant 0 : index
      %78 = vector.load %arg6[%c0_54, %c0_55, %c0_56, %c0_57] : memref<1x1x8x1xf32, #tpu.memory_space<vmem>>, vector<1x1x8x1xf32>
      %79 = vector.shape_cast %78 : vector<1x1x8x1xf32> to vector<8x1xf32>
      %80 = vector.shape_cast %77 : vector<8x1xf32> to vector<1x1x8x1xf32>
      tpu.vector_store %arg6[%c0_54, %c0_55, %c0_56, %c0_57], %80 {strides = array<i32>} : memref<1x1x8x1xf32, #tpu.memory_space<vmem>>, vector<1x1x8x1xf32>,
      %cst_58 = arith.constant 0.000000e+00 : f32
      %81 = vector.broadcast %cst_58 : f32 to vector<8x1xf32>
      %c0_59 = arith.constant 0 : index
      %c0_60 = arith.constant 0 : index
      %c0_61 = arith.constant 0 : index
      %c0_62 = arith.constant 0 : index
      %82 = vector.load %arg7[%c0_59, %c0_60, %c0_61, %c0_62] : memref<1x1x8x1xf32, #tpu.memory_space<vmem>>, vector<1x1x8x1xf32>
      %83 = vector.shape_cast %82 : vector<1x1x8x1xf32> to vector<8x1xf32>
      %84 = vector.shape_cast %81 : vector<8x1xf32> to vector<1x1x8x1xf32>
      tpu.vector_store %arg7[%c0_59, %c0_60, %c0_61, %c0_62], %84 {strides = array<i32>} : memref<1x1x8x1xf32, #tpu.memory_space<vmem>>, vector<1x1x8x1xf32>,
      %cst_63 = arith.constant 0.000000e+00 : f32
      %85 = vector.broadcast %cst_63 : f32 to vector<8x1xf32>
      %c0_64 = arith.constant 0 : index
      %c0_65 = arith.constant 0 : index
      %c0_66 = arith.constant 0 : index
      %c0_67 = arith.constant 0 : index
      %86 = vector.load %arg8[%c0_64, %c0_65, %c0_66, %c0_67] : memref<1x1x8x1xf32, #tpu.memory_space<vmem>>, vector<1x1x8x1xf32>
      %87 = vector.shape_cast %86 : vector<1x1x8x1xf32> to vector<8x1xf32>
      %88 = vector.shape_cast %85 : vector<8x1xf32> to vector<1x1x8x1xf32>
      tpu.vector_store %arg8[%c0_64, %c0_65, %c0_66, %c0_67], %88 {strides = array<i32>} : memref<1x1x8x1xf32, #tpu.memory_space<vmem>>, vector<1x1x8x1xf32>,
    } else {
    }
    %c0 = arith.constant 0 : index
    %c0_1 = arith.constant 0 : index
    %c0_2 = arith.constant 0 : index
    %3 = vector.load %arg3[%c0, %c0_1, %c0_2] : memref<1x8x128xf32, #tpu.memory_space<vmem>>, vector<1x8x128xf32>
    %4 = vector.shape_cast %3 : vector<1x8x128xf32> to vector<8x128xf32>
    %c0_3 = arith.constant 0 : index
    %c0_4 = arith.constant 0 : index
    %c0_5 = arith.constant 0 : index
    %5 = vector.load %arg4[%c0_3, %c0_4, %c0_5] : memref<1x8x128xf32, #tpu.memory_space<vmem>>, vector<1x8x128xf32>
    %6 = vector.shape_cast %5 : vector<1x8x128xf32> to vector<8x128xf32>
    %c128_i32 = arith.constant 128 : i32
    %7 = arith.muli %arg2, %c128_i32 : i32
    %8 = arith.sitofp %7 : i32 to f32
    %cst = arith.constant 1.280000e+02 : f32
    %9 = arith.addf %8, %cst : f32
    %cst_6 = arith.constant dense<0.000000e+00> : vector<8xf32>
    %10 = vector.multi_reduction <add>, %4, %cst_6 [1] : vector<8x128xf32> to vector<8xf32>
    %11 = vector.shape_cast %10 : vector<8xf32> to vector<8x1xf32>
    %cst_7 = arith.constant 7.812500e-03 : f32
    %12 = vector.broadcast %cst_7 : f32 to vector<8x1xf32>
    %13 = arith.mulf %11, %12 : vector<8x1xf32>
    %14 = vector.broadcast %13 : vector<8x1xf32> to vector<8x128xf32>
    %15 = arith.subf %4, %14 : vector<8x128xf32>
    %16 = arith.mulf %15, %15 : vector<8x128xf32>
    %cst_8 = arith.constant dense<0.000000e+00> : vector<8xf32>
    %17 = vector.multi_reduction <add>, %16, %cst_8 [1] : vector<8x128xf32> to vector<8xf32>
    %18 = vector.shape_cast %17 : vector<8xf32> to vector<8x1xf32>
    %c0_9 = arith.constant 0 : index
    %c0_10 = arith.constant 0 : index
    %c0_11 = arith.constant 0 : index
    %c0_12 = arith.constant 0 : index
    %19 = vector.load %arg5[%c0_9, %c0_10, %c0_11, %c0_12] : memref<1x1x8x1xf32, #tpu.memory_space<vmem>>, vector<1x1x8x1xf32>
    %20 = vector.shape_cast %19 : vector<1x1x8x1xf32> to vector<8x1xf32>
    %21 = arith.subf %13, %20 : vector<8x1xf32>
    %cst_13 = arith.constant 1.280000e+02 : f32
    %22 = arith.divf %cst_13, %9 : f32
    %23 = vector.broadcast %22 : f32 to vector<8x1xf32>
    %24 = arith.mulf %21, %23 : vector<8x1xf32>
    %25 = arith.addf %20, %24 : vector<8x1xf32>
    %c0_14 = arith.constant 0 : index
    %c0_15 = arith.constant 0 : index
    %c0_16 = arith.constant 0 : index
    %c0_17 = arith.constant 0 : index
    %26 = vector.load %arg5[%c0_14, %c0_15, %c0_16, %c0_17] : memref<1x1x8x1xf32, #tpu.memory_space<vmem>>, vector<1x1x8x1xf32>
    %27 = vector.shape_cast %26 : vector<1x1x8x1xf32> to vector<8x1xf32>
    %28 = vector.shape_cast %25 : vector<8x1xf32> to vector<1x1x8x1xf32>
    tpu.vector_store %arg5[%c0_14, %c0_15, %c0_16, %c0_17], %28 {strides = array<i32>} : memref<1x1x8x1xf32, #tpu.memory_space<vmem>>, vector<1x1x8x1xf32>,
    %c0_18 = arith.constant 0 : index
    %c0_19 = arith.constant 0 : index
    %c0_20 = arith.constant 0 : index
    %c0_21 = arith.constant 0 : index
    %29 = vector.load %arg6[%c0_18, %c0_19, %c0_20, %c0_21] : memref<1x1x8x1xf32, #tpu.memory_space<vmem>>, vector<1x1x8x1xf32>
    %30 = vector.shape_cast %29 : vector<1x1x8x1xf32> to vector<8x1xf32>
    %31 = arith.addf %30, %18 : vector<8x1xf32>
    %32 = arith.mulf %21, %21 : vector<8x1xf32>
    %33 = arith.mulf %8, %22 : f32
    %34 = vector.broadcast %33 : f32 to vector<8x1xf32>
    %35 = arith.mulf %32, %34 : vector<8x1xf32>
    %36 = arith.addf %31, %35 : vector<8x1xf32>
    %c0_22 = arith.constant 0 : index
    %c0_23 = arith.constant 0 : index
    %c0_24 = arith.constant 0 : index
    %c0_25 = arith.constant 0 : index
    %37 = vector.load %arg6[%c0_22, %c0_23, %c0_24, %c0_25] : memref<1x1x8x1xf32, #tpu.memory_space<vmem>>, vector<1x1x8x1xf32>
    %38 = vector.shape_cast %37 : vector<1x1x8x1xf32> to vector<8x1xf32>
    %39 = vector.shape_cast %36 : vector<8x1xf32> to vector<1x1x8x1xf32>
    tpu.vector_store %arg6[%c0_22, %c0_23, %c0_24, %c0_25], %39 {strides = array<i32>} : memref<1x1x8x1xf32, #tpu.memory_space<vmem>>, vector<1x1x8x1xf32>,
    %c128_i32_26 = arith.constant 128 : i32
    %40 = arith.muli %arg2, %c128_i32_26 : i32
    %41 = arith.sitofp %40 : i32 to f32
    %cst_27 = arith.constant 1.280000e+02 : f32
    %42 = arith.addf %41, %cst_27 : f32
    %cst_28 = arith.constant dense<0.000000e+00> : vector<8xf32>
    %43 = vector.multi_reduction <add>, %6, %cst_28 [1] : vector<8x128xf32> to vector<8xf32>
    %44 = vector.shape_cast %43 : vector<8xf32> to vector<8x1xf32>
    %cst_29 = arith.constant 7.812500e-03 : f32
    %45 = vector.broadcast %cst_29 : f32 to vector<8x1xf32>
    %46 = arith.mulf %44, %45 : vector<8x1xf32>
    %47 = vector.broadcast %46 : vector<8x1xf32> to vector<8x128xf32>
    %48 = arith.subf %6, %47 : vector<8x128xf32>
    %49 = arith.mulf %48, %48 : vector<8x128xf32>
    %cst_30 = arith.constant dense<0.000000e+00> : vector<8xf32>
    %50 = vector.multi_reduction <add>, %49, %cst_30 [1] : vector<8x128xf32> to vector<8xf32>
    %51 = vector.shape_cast %50 : vector<8xf32> to vector<8x1xf32>
    %c0_31 = arith.constant 0 : index
    %c0_32 = arith.constant 0 : index
    %c0_33 = arith.constant 0 : index
    %c0_34 = arith.constant 0 : index
    %52 = vector.load %arg7[%c0_31, %c0_32, %c0_33, %c0_34] : memref<1x1x8x1xf32, #tpu.memory_space<vmem>>, vector<1x1x8x1xf32>
    %53 = vector.shape_cast %52 : vector<1x1x8x1xf32> to vector<8x1xf32>
    %54 = arith.subf %46, %53 : vector<8x1xf32>
    %cst_35 = arith.constant 1.280000e+02 : f32
    %55 = arith.divf %cst_35, %42 : f32
    %56 = vector.broadcast %55 : f32 to vector<8x1xf32>
    %57 = arith.mulf %54, %56 : vector<8x1xf32>
    %58 = arith.addf %53, %57 : vector<8x1xf32>
    %c0_36 = arith.constant 0 : index
    %c0_37 = arith.constant 0 : index
    %c0_38 = arith.constant 0 : index
    %c0_39 = arith.constant 0 : index
    %59 = vector.load %arg7[%c0_36, %c0_37, %c0_38, %c0_39] : memref<1x1x8x1xf32, #tpu.memory_space<vmem>>, vector<1x1x8x1xf32>
    %60 = vector.shape_cast %59 : vector<1x1x8x1xf32> to vector<8x1xf32>
    %61 = vector.shape_cast %58 : vector<8x1xf32> to vector<1x1x8x1xf32>
    tpu.vector_store %arg7[%c0_36, %c0_37, %c0_38, %c0_39], %61 {strides = array<i32>} : memref<1x1x8x1xf32, #tpu.memory_space<vmem>>, vector<1x1x8x1xf32>,
    %c0_40 = arith.constant 0 : index
    %c0_41 = arith.constant 0 : index
    %c0_42 = arith.constant 0 : index
    %c0_43 = arith.constant 0 : index
    %62 = vector.load %arg8[%c0_40, %c0_41, %c0_42, %c0_43] : memref<1x1x8x1xf32, #tpu.memory_space<vmem>>, vector<1x1x8x1xf32>
    %63 = vector.shape_cast %62 : vector<1x1x8x1xf32> to vector<8x1xf32>
    %64 = arith.addf %63, %51 : vector<8x1xf32>
    %65 = arith.mulf %54, %54 : vector<8x1xf32>
    %66 = arith.mulf %41, %55 : f32
    %67 = vector.broadcast %66 : f32 to vector<8x1xf32>
    %68 = arith.mulf %65, %67 : vector<8x1xf32>
    %69 = arith.addf %64, %68 : vector<8x1xf32>
    %c0_44 = arith.constant 0 : index
    %c0_45 = arith.constant 0 : index
    %c0_46 = arith.constant 0 : index
    %c0_47 = arith.constant 0 : index
    %70 = vector.load %arg8[%c0_44, %c0_45, %c0_46, %c0_47] : memref<1x1x8x1xf32, #tpu.memory_space<vmem>>, vector<1x1x8x1xf32>
    %71 = vector.shape_cast %70 : vector<1x1x8x1xf32> to vector<8x1xf32>
    %72 = vector.shape_cast %69 : vector<8x1xf32> to vector<1x1x8x1xf32>
    tpu.vector_store %arg8[%c0_44, %c0_45, %c0_46, %c0_47], %72 {strides = array<i32>} : memref<1x1x8x1xf32, #tpu.memory_space<vmem>>, vector<1x1x8x1xf32>,
    return
  }
  func.func @transform_0(%arg0: i32, %arg1: i32, %arg2: i32) -> (i32, i32, i32) {
    %c1_i32 = arith.constant 1 : i32
    %0 = arith.muli %arg1, %c1_i32 : i32
    %1 = arith.addi %0, %arg2 : i32
    %c0_i32 = arith.constant 0 : i32
    %c0_i32_0 = arith.constant 0 : i32
    return %arg0, %c0_i32, %1 : i32, i32, i32
  }
  func.func @transform_1(%arg0: i32, %arg1: i32, %arg2: i32) -> (i32, i32, i32) {
    %c1_i32 = arith.constant 1 : i32
    %0 = arith.muli %arg1, %c1_i32 : i32
    %1 = arith.addi %0, %arg2 : i32
    %c0_i32 = arith.constant 0 : i32
    %c0_i32_0 = arith.constant 0 : i32
    return %arg0, %c0_i32, %1 : i32, i32, i32
  }
  func.func @transform_2(%arg0: i32, %arg1: i32, %arg2: i32) -> (i32, i32, i32, i32) {
    %c0_i32 = arith.constant 0 : i32
    %c0_i32_0 = arith.constant 0 : i32
    %c0_i32_1 = arith.constant 0 : i32
    return %arg0, %arg1, %c0_i32, %c0_i32_0 : i32, i32, i32, i32
  }
  func.func @transform_3(%arg0: i32, %arg1: i32, %arg2: i32) -> (i32, i32, i32, i32) {
    %c0_i32 = arith.constant 0 : i32
    %c0_i32_0 = arith.constant 0 : i32
    %c0_i32_1 = arith.constant 0 : i32
    return %arg0, %arg1, %c0_i32, %c0_i32_0 : i32, i32, i32, i32
  }
  func.func @transform_4(%arg0: i32, %arg1: i32, %arg2: i32) -> (i32, i32, i32, i32) {
    %c0_i32 = arith.constant 0 : i32
    %c0_i32_0 = arith.constant 0 : i32
    %c0_i32_1 = arith.constant 0 : i32
    return %arg0, %arg1, %c0_i32, %c0_i32_0 : i32, i32, i32, i32
  }
  func.func @transform_5(%arg0: i32, %arg1: i32, %arg2: i32) -> (i32, i32, i32, i32) {
    %c0_i32 = arith.constant 0 : i32
    %c0_i32_0 = arith.constant 0 : i32
    %c0_i32_1 = arith.constant 0 : i32
    return %arg0, %arg1, %c0_i32, %c0_i32_0 : i32, i32, i32, i32
  }
}

</mosaic_0001>

<bundles_post_ra>
// kernel: tpu_custom_call.1
= control target key start
LH: loop header
LB: loop body
LE: loop exit
PB: predicated region body
PF: predicated region fallthrough
CT: control target
= control target key end

     0   :  { %11 = vsyncpa [#allocation3], 0  ;;  %s1094_s0 = inlined_call_operand.hbm [shape: f32[2,8,128], index: 0, kind: input, shape index: {}]   ;;  %s1095_s1 = inlined_call_operand.hbm [shape: f32[2,8,128], index: 1, kind: input, shape index: {}]   ;;  %s1096_s2 = inlined_call_operand.vmem [shape: f32[2,1,8,1], index: 2, kind: output, shape index: {0}]   ;;  %s1097_s3 = inlined_call_operand.vmem [shape: f32[2,1,8,1], index: 3, kind: output, shape index: {1}]   ;;  %s1098_s4 = inlined_call_operand.vmem [shape: f32[2,1,8,1], index: 4, kind: output, shape index: {2}]   ;;  %s1099_s5 = inlined_call_operand.vmem [shape: f32[2,1,8,1], index: 5, kind: output, shape index: {3}]  }
   0x1   :  { %13 = vsyncpa [#allocation3 + $0x1], 0 }
   0x2   :  { %14 = vsyncpa [#allocation5], 0 }
   0x3   :  { %16 = vsyncpa [#allocation5 + $0x1], 0  ;;  %s894_s18 = smov 0   ;;  %s896_s19 = smov 0  }
   0x4   :  { %s898_s20 = smov 0   ;;  %s900_s21 = smov 0  }
   0x5   :  { %s902_s22 = smov 0   ;;  %s904_s23 = smov 0  }
   0x6 LB: > { %s667_s24 = sadd.s32 4294967295, %s859_s23   ;;  %s41_s25 = sadd.s32 1, %s855_s22  ;;  %s859_s23 = sphi %s904_s23, %s22_s23   ;;  %s855_s22 = sphi %s902_s22, %s1113_s22   ;;  %s851_s21 = sphi %s900_s21, %s1112_s21   ;;  %s847_s20 = sphi %s898_s20, %s1111_s20   ;;  %s843_s19 = sphi %s896_s19, %s1110_s19   ;;  %s839_s18 = sphi %s894_s18, %s1109_s18  }
   0x7   : > { %p43_p0 = scmp.ge.s32.totalorder %s41_s25, 2  ;;  %s52_s26 = sadd.s32 1, %s847_s20 }
   0x8   : > { %p59_p1 = scmp.ne.s32.totalorder %s847_s20, %s843_s19  ;;  %p60_p2 = scmp.eq.s32.totalorder %s859_s23, 0 }
   0x9   : > { %s1115_s25 = smov (%p43_p0, %s41_s25), 0  ;;  %p65_p4 = scmp.ne.s32.totalorder %s843_s19, %s839_s18 }
   0xa   : > { %p930_p3 = por %p60_p2, %p59_p1  ;;  %s47_s28 = ssub.s32 %s855_s22, %s1115_s25 }
   0xb   : > { %p66_p5 = scmp.eq.s32.totalorder %s667_s24, 0  ;;  %p50_p6 = scmp.eq.s32.totalorder %s47_s28, 0 }
   0xc   : > { %p695_p8 = scmp.lt.s32.totalorder %s859_s23, 2  ;;  %s946_s6 = sand.u32 1, %s847_s20  }
   0xd   : > { %p937_p7 = por %p66_p5, %p65_p4  ;;  %s672_s7 = sshll.u32 %s855_s22, 7 }
   0xe   : > { %s943_s30 = scalar_select %p50_p6, %s847_s20, %s52_s26  }
   0xf   : > { %s1102_s29 = scalar_select %p937_p7, 1, 0 }
  0x10   : > { %s671_s8 = sshll.u32 %s946_s6, 3  ;;  %s955_s11 = scalar_lea.hbm %s1094_s0, %s672_s7 }
  0x11   : > { %s235_s12 = scalar_lea.vmem [#allocation2], %s671_s8  ;;  %p961_p9 = pnand %p695_p8, %p930_p3 }
  0x12   : > { %s244_s13 = sshll.u32 %s235_s12, 4  ;;  %s232_s15 = scalar_lea.sflag [#allocation3], %s946_s6  ;;  %s965_s13 = int_to_ptr.vmem [resolvable:$true] %s244_s13 }
  0x13   : > { %s745_s16 = scalar_lea.hbm %s955_s11, 128  ;;  %p747_p13 = pneg %p961_p9 }
  0x14   : > { %p746_p12 = scmp.ne.s32.totalorder %s955_s11, %s745_s16  ;;  %s750_s24 = scalar_lea.hbm %s1094_s0, 256 }
  0x15   : > { %p751_p2 = scmp.lt.u32.totalorder %s955_s11, %s1094_s0  ;;  %p752_p3 = scmp.lt.u32.totalorder %s750_s24, %s745_s16 }
  0x16   : > { %p748_p0 = pnand %p747_p13, %p746_p12  ;;  %p754_p5 = scmp.lt.u32.totalorder %s745_s16, %s955_s11 }
  0x17   : > { %p753_p4 = por %p752_p3, %p751_p2 }
  0x18   : > { %p749_p1 = pneg %p748_p0 }
  0x19   : > { %p755_p6 = por %p754_p5, %p753_p4 }
  0x1b   : > { %p756_p8 = pnand %p755_p6, %p749_p1 }
  0x1d   : > { %759 = shalt.err (!%p756_p8)
}
  0x1e   : > { %s760_s28 = scalar_lea.vmem %s965_s13, 128  ;;  %s861_s9 = smov [#allocation2]  }
  0x1f   : > { %p761_p12 = scmp.ne.s32.totalorder %s965_s13, %s760_s28  ;;  %s765_s10 = sshll.u32 %s861_s9, 4  ;;  %s766_s10 = int_to_ptr.vmem [resolvable:$false] %s765_s10 }
  0x20   : > { %s767_s12 = scalar_lea.vmem %s766_s10, 256  ;;  %p768_p11 = scmp.lt.s32.totalorder %s965_s13, %s766_s10 }
  0x21   : > { %p763_p0 = pnand %p761_p12, %p747_p13  ;;  %p769_p2 = scmp.lt.s32.totalorder %s767_s12, %s760_s28 }
  0x23   : > { %p764_p10 = pneg %p763_p0  ;;  %p770_p3 = por %p769_p2, %p768_p11 }
  0x25   : > { %p771_p4 = pnand %p770_p3, %p764_p10 }
  0x27   : > { %774 = shalt.err (!%p771_p4)
}
  0x28   : > { %691 = dma.hbm_to_vmem [thread:$0]  (!%p961_p9), %s955_s11, 128, %s965_s13, %s232_s15  }
  0x29   : > { %p1104_p1 = scmp.lt.s32.totalorder %s859_s23, 3  ;;  %p1105_p5 = scmp.ge.s32.totalorder %s859_s23, 1 }
  0x2a   : > { %s1008_s24 = scalar_lea.hbm %s1095_s1, %s672_s7  ;;  %s255_s26 = scalar_lea.vmem [#allocation4], %s671_s8 }
  0x2b   : > { %p999_p6 = pnand %p1105_p5, %p1104_p1  ;;  %s264_s27 = sshll.u32 %s255_s26, 4  ;;  %s265_s27 = int_to_ptr.vmem [resolvable:$true] %s264_s27 }
  0x2c   : > { %s252_s11 = scalar_lea.sflag [#allocation5], %s946_s6  ;;  %s775_s13 = scalar_lea.hbm %s1008_s24, 128 }
  0x2d   : > { %s1106_s16 = scalar_select %p999_p6, 1, 0 }
  0x2e   : > { %p776_p10 = scmp.ne.s32.totalorder %s1008_s24, %s775_s13  ;;  %s780_s7 = scalar_lea.hbm %s1095_s1, 256 }
  0x2f   : > { %p781_p12 = scmp.lt.u32.totalorder %s1008_s24, %s1095_s1  ;;  %p782_p0 = scmp.lt.u32.totalorder %s780_s7, %s775_s13 }
  0x30   : > { %p778_p11 = pnand %p776_p10, %p747_p13  ;;  %p784_p3 = scmp.lt.u32.totalorder %s775_s13, %s1008_s24 }
  0x31   : > { %p783_p2 = por %p782_p0, %p781_p12 }
  0x32   : > { %p779_p8 = pneg %p778_p11 }
  0x33   : > { %p785_p4 = por %p784_p3, %p783_p2 }
  0x35   : > { %p786_p1 = pnand %p785_p4, %p779_p8 }
  0x37   : > { %789 = shalt.err (!%p786_p1)
}
  0x38   : > { %s790_s6 = scalar_lea.vmem %s265_s27, 128  ;;  %s862_s8 = smov [#allocation4]  }
  0x39   : > { %p791_p5 = scmp.ne.s32.totalorder %s265_s27, %s790_s6  ;;  %s795_s12 = sshll.u32 %s862_s8, 4  ;;  %s796_s12 = int_to_ptr.vmem [resolvable:$false] %s795_s12 }
  0x3a   : > { %s797_s17 = scalar_lea.vmem %s796_s12, 256  ;;  %p798_p7 = scmp.lt.s32.totalorder %s265_s27, %s796_s12 }
  0x3b   : > { %p793_p10 = pnand %p791_p5, %p747_p13  ;;  %p799_p6 = scmp.lt.s32.totalorder %s797_s17, %s790_s6 }
  0x3d   : > { %p794_p11 = pneg %p793_p10  ;;  %p800_p0 = por %p799_p6, %p798_p7 }
  0x3f   : > { %p801_p12 = pnand %p800_p0, %p794_p11 }
  0x41   : > { %804 = shalt.err (!%p801_p12)
}
  0x42   : > { %694 = dma.hbm_to_vmem [thread:$0]  (!%p961_p9), %s1008_s24, 128, %s265_s27, %s252_s11  }
  0x43   : > { %p1107_p8 = scmp.ne.s32.totalorder %s1106_s16, 0 }
  0x44   : > { %s275_s18 = sand.u32 (!%p1107_p8), 1, %s843_s19   ;;  %p1108_p13 = scmp.ne.s32.totalorder (!%p1107_p8), %s1102_s29, 0 }
  0x45   : > { %273 = sbr.rel (%p1107_p8) target bundleno = 379 (0x17b), region = 28  ;;  %s676_s26 = sshll.u32 (!%p1107_p8), %s275_s18, 3 }
  0x46   : > { %s276_s13 = scalar_lea.sflag (!%p1107_p8), [#allocation3], %s275_s18  ;;  %s279_s15 = scalar_lea.vmem (!%p1107_p8), [#allocation2], %s676_s26 }
  0x4c   : > { %830 = dma.done.wait (%p1108_p13), %s276_s13, 128  }
  0x4d   : > { %832 = vsyncadd (%p1108_p13), %s276_s13, 4294967168  ;;  %s285_s28 = scalar_lea.sflag [#allocation5], %s275_s18  ;;  %s288_s7 = scalar_lea.vmem [#allocation4], %s676_s26 }
  0x4e   : > { %834 = dma.done.wait (%p1108_p13), %s285_s28, 128  }
  0x4f   : > { %836 = vsyncadd (%p1108_p13), %s285_s28, 4294967168  ;;  %p345_p7 = scmp.lt.s32.totalorder %s851_s21, 1  ;;  %vm377_vm0 = vcmask 7168   ;;  %v863_v0 = vmov 0.0   ;;  %v382_v1 = vld [vmem:[%s279_s15] sm:$0xff]  ;;  %v383_v2 = vld [vmem:[%s288_s7] sm:$0xff] }
  0x50   : > { %387 = vadd.xlane.f32.xlu0 %v382_v1 }
  0x51   : > { %s1117_s21 = smov (!%p345_p7, %s851_s21), 1 }
  0x52   : > { %s1045_s14 = sshll.u32 %s1117_s21, 3 }
  0x53   : > { %s351_s27 = scalar_lea.vmem %s1096_s2, %s1045_s14  ;;  %s365_s9 = scalar_lea.vmem %s1098_s4, %s1045_s14 }
  0x54   : > { %378 = vst.msk [vmem:[%s351_s27] sm:$0xff] %vm377_vm0, %v863_v0  ;;  %413 = vadd.xlane.f32.xlu0 %v383_v2  ;;  %380 = vst.msk [vmem:[%s365_s9] sm:$0xff] %vm377_vm0, %v863_v0  ;;  %s1061_s6 = scalar_lea.vmem %s1097_s3, %s1045_s14  ;;  %s372_s17 = scalar_lea.vmem %s1099_s5, %s1045_s14 }
  0x55   : > { %379 = vst.msk [vmem:[%s1061_s6] sm:$0xff] %vm377_vm0, %v863_v0  ;;  %381 = vst.msk [vmem:[%s372_s17] sm:$0xff] %vm377_vm0, %v863_v0 }
  0x5b   : > { %v394_v4 = vld [vmem:[%s351_s27] sm:$0xff] }
  0x5c   : > { %v420_v9 = vld [vmem:[%s365_s9] sm:$0xff] }
  0x5d   : > { %v405_v18 = vld [vmem:[%s1061_s6] sm:$0xff] }
  0x5e   : > { %v425_v23 = vld [vmem:[%s372_s17] sm:$0xff] }
  0xdd   : > { %v388_v3 = vpop.xlane.xlu0 %387 }
  0xde   : > { %v389_v5 = vmul.f32 0.0078125, %v388_v3 }
  0xe0   : > { %v395_v6 = vsub.f32 %v389_v5, %v394_v4  ;;  %v390_v7 = vsub.f32 %v382_v1, %v389_v5 }
  0xe1   : > { %v414_v8 = vpop.xlane.xlu0 %413 }
  0xe2   : > { %v402_v10 = vadd.f32 %v395_v6, %v394_v4  ;;  %v415_v11 = vmul.f32 0.0078125, %v414_v8  ;;  %v391_v12 = vmul.f32 %v390_v7, %v390_v7  ;;  %v407_v17 = vmul.f32 %v395_v6, %v395_v6 }
  0xe4   : > { %404 = vst.msk [vmem:[%s351_s27] sm:$0xff] %vm377_vm0, %v402_v10  ;;  %v416_v13 = vsub.f32 %v383_v2, %v415_v11  ;;  %v421_v14 = vsub.f32 %v415_v11, %v420_v9  ;;  %392 = vadd.xlane.f32.xlu1 %v391_v12  ;;  %v410_v22 = vmul.f32 0.0, %v407_v17 }
  0xe6   : > { %v423_v15 = vadd.f32 %v421_v14, %v420_v9  ;;  %v417_v16 = vmul.f32 %v416_v13, %v416_v13  ;;  %v427_v20 = vmul.f32 %v421_v14, %v421_v14 }
  0xe8   : > { %424 = vst.msk [vmem:[%s365_s9] sm:$0xff] %vm377_vm0, %v423_v15  ;;  %418 = vadd.xlane.f32.xlu1 %v417_v16  ;;  %v428_v26 = vmul.f32 0.0, %v427_v20 }
 0x171   : > { %v393_v19 = vpop.xlane.xlu1 %392 }
 0x172   : > { %v406_v21 = vadd.f32 %v405_v18, %v393_v19 }
 0x174   : > { %v411_v24 = vadd.f32 %v410_v22, %v406_v21 }
 0x175   : > { %v419_v25 = vpop.xlane.xlu1 %418 }
 0x176   : > { %412 = vst.msk [vmem:[%s1061_s6] sm:$0xff] %vm377_vm0, %v411_v24  ;;  %v426_v27 = vadd.f32 %v425_v23, %v419_v25 }
 0x178   : > { %v429_v28 = vadd.f32 %v428_v26, %v426_v27 }
 0x17a   : > { %430 = vst.msk [vmem:[%s372_s17] sm:$0xff] %vm377_vm0, %v429_v28 }
 0x17b PF: > { %s22_s23 = sadd.s32 1, %s859_s23   ;;  %s1109_s18 = smov %s843_s19 }
 0x17c   : > { %p19_p9 = scmp.ge.s32.totalorder %s22_s23, 4   ;;  %s1110_s19 = smov %s847_s20 }
 0x17d   : > { %s1111_s20 = smov %s943_s30  ;;  %s1112_s21 = smov %s855_s22 }
 0x17e   : > { %s1113_s22 = smov %s1115_s25  ;;  %21 = sbr.rel (!%p19_p9) target bundleno = 6 (0x6), region = 121 }
 0x185   :  { %516 = vsyncpa [#allocation3], 1 }
 0x186   :  { %518 = vsyncpa [#allocation3 + $0x1], 1 }
 0x187   :  { %519 = vsyncpa [#allocation5], 1 }
 0x188   :  { %521 = vsyncpa [#allocation5 + $0x1], 1 }

</bundles_post_ra>
